<compile_context>
chip_gen: v7x
topology: tpu7x:2x2x1
jax: 0.10.0
libtpu: 0.0.40
codegen_flags: <defaults>
</compile_context>

<pallas_src>
import functools

import jax
import jax.numpy as jnp
from jax.experimental import pallas as pl
from jax.experimental.pallas import tpu as pltpu

_LANE = 128
_SUBLANE = 8


def _sin_kernel(x_ref, o_ref):
    x = x_ref[...].astype(jnp.float32)
    o_ref[...] = (jnp.sin(x) * 30.0).astype(o_ref.dtype)


@functools.lru_cache(maxsize=1)
def _num_tensorcores_per_device():
    """Best-effort TensorCores-per-device detection (v7x=2, v5e/v6e=1)."""
    try:
        info = pltpu.get_tpu_info()
        for attr in ("num_cores", "tensorcore_count", "num_tensorcores", "core_count"):
            v = getattr(info, attr, None)
            if isinstance(v, int) and v > 0:
                return min(v, 2)
    except Exception:
        pass
    try:
        kind = jax.devices()[0].device_kind.lower()
        if "v7" in kind or "7x" in kind:
            return 2
    except Exception:
        pass
    return 1


def _choose_cols(n):
    """Widest lane count (multiple of 128) that divides n, else None."""
    for c in (2048, 1024, 512, 256, 128):
        if n % c == 0:
            return c
    return None


def _choose_tile_rows(rows, cols, itemsize, target_block_bytes, num_cores):
    bytes_per_row = cols * itemsize
    target = target_block_bytes // bytes_per_row
    if target >= rows:
        return rows  # single full-extent block (small/mid inputs)
    target = max(_SUBLANE, (target // _SUBLANE) * _SUBLANE)

    # Number of blocks; on multi-TC chips keep it a multiple of the core count
    # so the megacore split ("parallel" grid axis) is balanced.
    nb0 = pl.cdiv(rows, target)
    if num_cores > 1:
        nb0 = -(-nb0 // num_cores) * num_cores

    # Prefer an exact tiling (no masked partial tail block): search a small
    # window of block counts >= nb0 for one that divides rows into
    # sublane-aligned tiles.
    step = num_cores if num_cores > 1 else 1
    for nb in range(nb0, nb0 + 8 * step, step):
        if rows % nb == 0 and (rows // nb) % _SUBLANE == 0:
            return rows // nb

    # Fall back to a cdiv grid (last block masked by Pallas).
    tile = -(-rows // nb0)
    return max(_SUBLANE, -(-tile // _SUBLANE) * _SUBLANE)


def _sin_slab(flat, target_block_bytes):
    """Run the kernel on a 1-D array whose length is a multiple of 128."""
    n = flat.shape[0]
    itemsize = jnp.dtype(flat.dtype).itemsize
    cols = _choose_cols(n)
    rows = n // cols
    slab = flat.reshape(rows, cols)

    num_cores = _num_tensorcores_per_device()
    tile_rows = _choose_tile_rows(rows, cols, itemsize, target_block_bytes, num_cores)
    grid = (pl.cdiv(rows, tile_rows),)

    out = pl.pallas_call(
        _sin_kernel,
        out_shape=jax.ShapeDtypeStruct((rows, cols), flat.dtype),
        grid_spec=pltpu.PrefetchScalarGridSpec(
            num_scalar_prefetch=0,
            grid=grid,
            in_specs=[pl.BlockSpec((tile_rows, cols), lambda i: (i, 0))],
            out_specs=pl.BlockSpec((tile_rows, cols), lambda i: (i, 0)),
        ),
        compiler_params=pltpu.CompilerParams(
            dimension_semantics=("parallel",),
            # 2 arrays x 2 pipeline buffers x ~8 MiB blocks = 32 MiB; 48 MiB
            # scoped leaves headroom and stays under v7x's 64 MiB physical.
            vmem_limit_bytes=48 * 1024 * 1024,
        ),
        # sin lowers to range reduction + polynomial on the VPU (~25 ops/elem).
        cost_estimate=pl.CostEstimate(
            flops=25 * n, transcendentals=n, bytes_accessed=2 * n * itemsize
        ),
    )(slab)
    return out


def sin_times_30(x, *, target_block_bytes=8 * 1024 * 1024,
                 small_input_bytes=128 * 1024, force_pallas=False):
    """Elementwise sin(x) * 30 via a tiled Pallas TPU kernel."""
    orig_shape = x.shape
    orig_dtype = x.dtype
    n = x.size
    itemsize = jnp.dtype(orig_dtype).itemsize

    if n == 0:
        return x

    # Tiny inputs: pallas_call launch + pipeline overhead dominates; let XLA
    # emit a fused elementwise op instead.
    if not force_pallas and n * itemsize < small_input_bytes:
        return (jnp.sin(x.astype(jnp.float32)) * 30.0).astype(orig_dtype)

    flat = x.reshape(-1)

    if n % _LANE == 0:
        return _sin_slab(flat, target_block_bytes).reshape(orig_shape)

    # Ragged size: run the kernel on the 128-aligned prefix; compute the
    # (<128-element) tail with plain XLA. No full-array pad/copy of the input.
    n_main = (n // _LANE) * _LANE
    if n_main == 0:
        return (jnp.sin(x.astype(jnp.float32)) * 30.0).astype(orig_dtype)
    head = _sin_slab(flat[:n_main], target_block_bytes).reshape(-1)
    tail = (jnp.sin(flat[n_main:].astype(jnp.float32)) * 30.0).astype(orig_dtype)
    return jnp.concatenate([head, tail]).reshape(orig_shape)


if __name__ == "__main__":
    key = jax.random.PRNGKey(0)
    k0, k1, k2, k3 = jax.random.split(key, 4)

    # Primary NCHW example (spec-consistent small shape), forced through the
    # Pallas kernel so the kernel path is exercised.
    x = jax.random.normal(k0, (2, 4, 16, 16), dtype=jnp.float32)
    y = sin_times_30(x, force_pallas=True)
    jax.block_until_ready(y)
    y_ref = jnp.sin(x) * 30.0
    assert y.shape == x.shape and y.dtype == x.dtype
    assert jnp.allclose(y, y_ref, atol=1e-4, rtol=1e-5)

    # Same shape through the small-input XLA fallback path.
    y_fb = sin_times_30(x)
    jax.block_until_ready(y_fb)
    assert jnp.allclose(y_fb, y_ref, atol=1e-4, rtol=1e-5)

    # Multi-block grid path (small target block to force >1 grid step).
    x2 = jax.random.normal(k1, (4, 8, 64, 64), dtype=jnp.float32)
    y2 = sin_times_30(x2, target_block_bytes=256 * 1024)
    jax.block_until_ready(y2)
    assert jnp.allclose(y2, jnp.sin(x2) * 30.0, atol=1e-4, rtol=1e-5)

    # Tiny odd-size input (pure fallback path).
    x3 = jax.random.normal(k2, (3, 5, 7), dtype=jnp.float32)
    y3 = sin_times_30(x3)
    jax.block_until_ready(y3)
    assert y3.shape == x3.shape
    assert jnp.allclose(y3, jnp.sin(x3) * 30.0, atol=1e-4, rtol=1e-5)

    # Larger odd-size input: 128-aligned prefix through the kernel + XLA tail.
    x4 = jax.random.normal(k3, (7, 129, 33), dtype=jnp.float32)
    y4 = sin_times_30(x4, force_pallas=True)
    jax.block_until_ready(y4)
    assert y4.shape == x4.shape
    assert jnp.allclose(y4, jnp.sin(x4) * 30.0, atol=1e-4, rtol=1e-5)

    print("KERNEL_OK")
</pallas_src>

<mosaic_0001>
module attributes {stable_mosaic.version = 11 : i64} {
  func.func @_sin_kernel(%arg0: i32, %arg1: memref<1x2048xf32, #tpu.memory_space<vmem>>, %arg2: memref<1x2048xf32, #tpu.memory_space<vmem>>) attributes {dimension_semantics = [#tpu.dimension_semantics<parallel>], iteration_bounds = array<i64: 1>, scalar_prefetch = 0 : i64, scratch_operands = 0 : i64, tpu.core_type = #tpu.core_type<tc>, window_params = [{transform_indices = @transform_0, window_bounds = array<i64: 1, 2048>}, {transform_indices = @transform_1, window_bounds = array<i64: 1, 2048>}]} {
    %c0 = arith.constant 0 : index
    %c0_0 = arith.constant 0 : index
    %0 = vector.load %arg1[%c0, %c0_0] : memref<1x2048xf32, #tpu.memory_space<vmem>>, vector<1x2048xf32>
    %1 = math.sin %0 : vector<1x2048xf32>
    %cst = arith.constant 3.000000e+01 : f32
    %2 = vector.broadcast %cst : f32 to vector<1x2048xf32>
    %3 = arith.mulf %1, %2 : vector<1x2048xf32>
    %c0_1 = arith.constant 0 : index
    %c0_2 = arith.constant 0 : index
    %4 = vector.load %arg2[%c0_1, %c0_2] : memref<1x2048xf32, #tpu.memory_space<vmem>>, vector<1x2048xf32>
    tpu.vector_store %arg2[%c0_1, %c0_2], %3 {strides = array<i32>} : memref<1x2048xf32, #tpu.memory_space<vmem>>, vector<1x2048xf32>,
    return
  }
  func.func @transform_0(%arg0: i32) -> (i32, i32) {
    %c0_i32 = arith.constant 0 : i32
    %c0_i32_0 = arith.constant 0 : i32
    return %arg0, %c0_i32 : i32, i32
  }
  func.func @transform_1(%arg0: i32) -> (i32, i32) {
    %c0_i32 = arith.constant 0 : i32
    %c0_i32_0 = arith.constant 0 : i32
    return %arg0, %c0_i32 : i32, i32
  }
}

</mosaic_0001>

<bundles_post_ra>
// kernel: tpu_custom_call.1
= control target key start
LH: loop header
LB: loop body
LE: loop exit
PB: predicated region body
PF: predicated region fallthrough
CT: control target
= control target key end

     0   :  { %6 = vsyncpa [#allocation3], 0  ;;  %s442_s0 = inlined_call_operand.hbm [shape: f32[1,2048], index: 0, kind: input, shape index: {}]   ;;  %s443_s1 = inlined_call_operand.hbm [shape: f32[1,2048], index: 1, kind: output, shape index: {}]  }
   0x1   :  { %7 = vsyncpa [#allocation4], 0  ;;  %s330_s6 = smov [#allocation2]   ;;  %s282_s10 = scalar_lea.hbm %s442_s0, 256 }
   0x2   :  { %s14_s7 = sshll.u32 %s330_s6, 4  ;;  %p283_p0 = scmp.ne.s32.totalorder %s442_s0, %s282_s10  ;;  %s15_s7 = int_to_ptr.vmem [resolvable:$true] %s14_s7 }
   0x3   :  { %p286_p1 = scmp.lt.u32.totalorder %s282_s10, %s442_s0 }
   0x5   :  { %p288_p2 = pnand %p286_p1, %p283_p0 }
   0x7   :  { %291 = shalt.err (!%p288_p2)
}
   0x8   :  { %s292_s15 = scalar_lea.vmem %s15_s7, 256  ;;  %p297_p4 = scmp.lt.s32.totalorder %s15_s7, %s15_s7 }
   0x9   :  { %p293_p3 = scmp.ne.s32.totalorder %s15_s7, %s292_s15  ;;  %p298_p5 = scmp.lt.s32.totalorder %s292_s15, %s292_s15 }
   0xb   :  { %p299_p6 = por %p298_p5, %p297_p4 }
   0xd   :  { %p300_p7 = pnand %p299_p6, %p293_p3 }
   0xf   :  { %303 = shalt.err (!%p300_p7)
}
  0x10   :  { %17 = dma.hbm_to_vmem [thread:$0]  %s442_s0, 256, %s15_s7, [#allocation3]  }
  0x11   :  { %326 = dma.done.wait [#allocation3], 256  }
  0x12   :  { %327 = vsyncadd [#allocation3], 4294967040  ;;  %v360_v0 = vld [vmem:[#allocation2] sm:$0xff]  ;;  %v362_v1 = vld [vmem:[#allocation2 + $0x8] sm:$0xff]  ;;  %v331_v24 = vmov 683565275  }
  0x13   :  { %v23_v2 = vand.u32 2147483647, %v360_v0  ;;  %v26_v3 = vand.u32 2139095040, %v360_v0  ;;  %v127_v4 = vand.u32 2147483647, %v362_v1  ;;  %v130_v5 = vand.u32 2139095040, %v362_v1 }
  0x14   :  { %v332_v26 = vmov 2475754826   ;;  %v333_v28 = vmov 2131351028   ;;  %v334_v30 = vmov 2102212464  }
  0x15   :  { %v27_v6 = vshrl.u32 %v26_v3, 23  ;;  %v30_v7 = vand.u32 8388607, %v23_v2  ;;  %v131_v8 = vshrl.u32 %v130_v5, 23  ;;  %v134_v9 = vand.u32 8388607, %v127_v4 }
  0x16   :  { %v335_v32 = vmov 920167782   ;;  %v336_v40 = vmov 1326507024   ;;  %vm25_vm14 = vcmp.lt.s32.totalorder %v360_v0, 0  ;;  %s337_s0 = smov [#allocation5]  }
  0x17   :  { %v250_v10 = vadd.s32 4294967169, %v27_v6  ;;  %v254_v11 = vadd.s32 4294967169, %v131_v8  ;;  %v31_v13 = vor.u32 8388608, %v30_v7  ;;  %v135_v14 = vor.u32 8388608, %v134_v9  ;;  %s241_s18 = sshll.u32 %s337_s0, 4  ;;  %s242_s18 = int_to_ptr.vmem [resolvable:$true] %s241_s18 }
  0x18   :  { %vm24_vm15 = vcmp.le.f32.partialorder %v23_v2, 0.7853982  ;;  %s304_s19 = scalar_lea.vmem %s242_s18, 256  ;;  %p309_p9 = scmp.lt.s32.totalorder %s242_s18, %s242_s18 }
  0x19   :  { %v33_v12 = vadd.s32 1, %v250_v10  ;;  %v137_v15 = vadd.s32 1, %v254_v11  ;;  %v372_v20 = vshll.u32 %v31_v13, 8  ;;  %v374_v22 = vshll.u32 %v135_v14, 8  ;;  %p305_p8 = scmp.ne.s32.totalorder %s242_s18, %s304_s19  ;;  %p310_p10 = scmp.lt.s32.totalorder %s304_s19, %s304_s19 }
  0x1b   :  { %vm34_vm0 = vcmp.gt.s32.totalorder %v33_v12, 0  ;;  %vm138_vm1 = vcmp.gt.s32.totalorder %v137_v15, 0  ;;  %p311_p11 = por %p310_p10, %p309_p9 }
  0x1c   :  { %v35_v16 = vsel %vm34_vm0, %v33_v12, 0  ;;  %v139_v19 = vsel %vm138_vm1, %v137_v15, 0  ;;  %vm129_vm0 = vcmp.lt.s32.totalorder %v362_v1, 0  ;;  %vm128_vm1 = vcmp.le.f32.partialorder %v127_v4, 0.7853982 }
  0x1d   :  { %v36_v17 = vshrl.u32 %v35_v16, 5  ;;  %v37_v18 = vand.u32 31, %v35_v16  ;;  %v141_v21 = vand.u32 31, %v139_v19  ;;  %v376_v34 = vshrl.u32 %v139_v19, 5  ;;  %p312_p12 = pnand %p311_p11, %p305_p8 }
  0x1f   :  { %v38_v23 = vsub.s32 32, %v37_v18  ;;  %v40_v25 = vshll.u32 %v331_v24, %v37_v18  ;;  %v43_v27 = vshll.u32 %v332_v26, %v37_v18  ;;  %v46_v29 = vshll.u32 %v333_v28, %v37_v18 }
  0x20   :  { %v49_v31 = vshll.u32 %v334_v30, %v37_v18  ;;  %v52_v33 = vshll.u32 %v335_v32, %v37_v18  ;;  %vm55_vm2 = vcmp.lt.s32.totalorder %v36_v17, 1  ;;  %vm56_vm3 = vcmp.lt.s32.totalorder %v36_v17, 2 }
  0x21   :  { %v39_v35 = vshrl.u32 %v331_v24, %v38_v23  ;;  %v41_v36 = vshrl.u32 %v332_v26, %v38_v23  ;;  %v44_v37 = vshrl.u32 %v333_v28, %v38_v23  ;;  %v47_v38 = vshrl.u32 %v334_v30, %v38_v23 }
  0x22   :  { %v50_v39 = vshrl.u32 %v335_v32, %v38_v23  ;;  %v53_v41 = vshrl.u32 %v336_v40, %v38_v23  ;;  %vm58_vm4 = vcmp.lt.s32.totalorder %v36_v17, 4  ;;  %v142_v45 = vsub.s32 32, %v141_v21 }
  0x23   :  { %v42_v42 = vor.u32 %v41_v36, %v40_v25  ;;  %v45_v43 = vor.u32 %v44_v37, %v43_v27  ;;  %v48_v44 = vor.u32 %v47_v38, %v46_v29  ;;  %vm57_vm5 = vcmp.lt.s32.totalorder %v36_v17, 3 }
  0x24   :  { %v51_v46 = vor.u32 %v50_v39, %v49_v31  ;;  %v54_v47 = vor.u32 %v53_v41, %v52_v33  ;;  %v144_v48 = vshll.u32 %v331_v24, %v141_v21  ;;  %v147_v56 = vshll.u32 %v332_v26, %v141_v21 }
  0x25   :  { %v59_v49 = vsel %vm55_vm2, %v39_v35, %v42_v42  ;;  %v60_v50 = vsel %vm58_vm4, %v48_v44, 2102212464  ;;  %v63_v51 = vsel %vm55_vm2, %v42_v42, %v45_v43  ;;  %v67_v52 = vsel %vm55_vm2, %v45_v43, %v48_v44 }
  0x26   :  { %v61_v53 = vsel %vm57_vm5, %v45_v43, %v60_v50  ;;  %v64_v54 = vsel %vm58_vm4, %v51_v46, 920167782  ;;  %v68_v55 = vsel %vm58_vm4, %v54_v47, 1326507024  ;;  %v143_v59 = vshrl.u32 %v331_v24, %v142_v45 }
  0x27   :  { %v65_v57 = vsel %vm57_vm5, %v48_v44, %v64_v54  ;;  %v69_v58 = vsel %vm57_vm5, %v51_v46, %v68_v55  ;;  %v145_v60 = vshrl.u32 %v332_v26, %v142_v45  ;;  %v62_v61 = vsel %vm56_vm3, %v59_v49, %v61_v53 }
  0x28   :  { %v66_v62 = vsel %vm56_vm3, %v63_v51, %v65_v57  ;;  %v70_v63 = vsel %vm56_vm3, %v67_v52, %v69_v58  ;;  %v148_v3 = vshrl.u32 %v333_v28, %v142_v45  ;;  %v150_v11 = vshll.u32 %v333_v28, %v141_v21 }
  0x29   :  { %v385_v5 = vmul.u32.u64.low %v372_v20, %v70_v63  ;;  %v386_v6 = vmul.u32.u64.high %v372_v20, %v70_v63, %v385_v5  ;;  %v389_v7 = vmul.u32.u64.low %v372_v20, %v66_v62  ;;  %v390_v8 = vmul.u32.u64.high %v372_v20, %v66_v62, %v389_v7 }
  0x2a   :  { %v146_v9 = vor.u32 %v145_v60, %v144_v48  ;;  %v149_v10 = vor.u32 %v148_v3, %v147_v56  ;;  %v151_v12 = vshrl.u32 %v334_v30, %v142_v45  ;;  %v153_v13 = vshll.u32 %v334_v30, %v141_v21 }
  0x2b   :  { %v154_v14 = vshrl.u32 %v335_v32, %v142_v45  ;;  %v156_v15 = vshll.u32 %v335_v32, %v141_v21  ;;  %v157_v16 = vshrl.u32 %v336_v40, %v142_v45  ;;  %v78_v17 = vmul.u32 %v372_v20, %v62_v61 }
  0x2c   :  { %v152_v18 = vor.u32 %v151_v12, %v150_v11  ;;  %vm159_vm6 = vcmp.lt.s32.totalorder %v376_v34, 1  ;;  %vm160_vm7 = vcmp.lt.s32.totalorder %v376_v34, 2  ;;  %vm80_vm8 = vc.u32 %v386_v6, %v389_v7 }
  0x2d   :  { %v81_v19 = vadd.s32 1, %v390_v8  ;;  %v155_v23 = vor.u32 %v154_v14, %v153_v13  ;;  %vm161_vm9 = vcmp.lt.s32.totalorder %v376_v34, 3  ;;  %v158_v24 = vor.u32 %v157_v16, %v156_v15 }
  0x2e   :  { %vm162_vm10 = vcmp.lt.s32.totalorder %v376_v34, 4  ;;  %v163_v25 = vsel %vm159_vm6, %v143_v59, %v146_v9  ;;  %v167_v21 = vsel %vm159_vm6, %v146_v9, %v149_v10  ;;  %v171_v28 = vsel %vm159_vm6, %v149_v10, %v152_v18 }
  0x2f   :  { %v82_v26 = vsel %vm80_vm8, %v81_v19, %v390_v8  ;;  %v164_v20 = vsel %vm162_vm10, %v152_v18, 2102212464  ;;  %v168_v27 = vsel %vm162_vm10, %v155_v23, 920167782  ;;  %v172_v32 = vsel %vm162_vm10, %v158_v24, 1326507024 }
  0x30   :  { %v83_v29 = vadd.s32 %v82_v26, %v78_v17  ;;  %v165_v30 = vsel %vm161_vm9, %v149_v10, %v164_v20  ;;  %v169_v31 = vsel %vm161_vm9, %v152_v18, %v168_v27  ;;  %v173_v36 = vsel %vm161_vm9, %v155_v23, %v172_v32 }
  0x31   :  { %v166_v33 = vsel %vm160_vm7, %v163_v25, %v165_v30  ;;  %v170_v35 = vsel %vm160_vm7, %v167_v21, %v169_v31  ;;  %v174_v38 = vsel %vm160_vm7, %v171_v28, %v173_v36  ;;  %v79_v57 = vadd.s32 %v389_v7, %v386_v6 }
  0x32   :  { %v84_v37 = vadd.s32 536870912, %v83_v29  ;;  %v407_v39 = vmul.u32.u64.low %v374_v22, %v170_v35  ;;  %v408_v40 = vmul.u32.u64.high %v374_v22, %v170_v35, %v407_v39  ;;  %v182_v44 = vmul.u32 %v374_v22, %v166_v33 }
  0x33   :  { %v411_v41 = vmul.u32.u64.low %v374_v22, %v174_v38  ;;  %v412_v42 = vmul.u32.u64.high %v374_v22, %v174_v38, %v411_v41  ;;  %vm115_vm5 = vweird.f32 %v360_v0  ;;  %vm219_vm9 = vweird.f32 %v362_v1 }
  0x34   :  { %v85_v43 = vshrl.u32 %v84_v37, 30  ;;  %v185_v46 = vadd.s32 1, %v408_v40 }
  0x35   :  { %vm184_vm11 = vc.u32 %v412_v42, %v407_v39  ;;  %v183_v13 = vadd.s32 %v407_v39, %v412_v42 }
  0x36   :  { %v86_v45 = vshll.u32 %v85_v43, 30  ;;  %v186_v34 = vsel %vm184_vm11, %v185_v46, %v408_v40  ;;  %v109_v6 = vsub.s32 4, %v85_v43 }
  0x37   :  { %v187_v48 = vadd.s32 %v186_v34, %v182_v44 }
  0x38   :  { %v87_v47 = vsub.s32 %v83_v29, %v86_v45  ;;  %v110_v25 = vsel %vm25_vm14, %v109_v6, %v85_v43 }
  0x39   :  { %v188_v50 = vadd.s32 536870912, %v187_v48  ;;  %v112_v28 = vsel %vm24_vm15, 0, %v110_v25 }
  0x3a   :  { %v89_v49 = vsub.s32 0, %v87_v47  ;;  %v116_v33 = vadd.s32 3, %v112_v28 }
  0x3b   :  { %v189_v52 = vshrl.u32 %v188_v50, 30 }
  0x3c   :  { %v251_v51 = vmin.u32 %v89_v49, %v87_v47  ;;  %v117_v37 = vand.u32 3, %v116_v33 }
  0x3d   :  { %v190_v54 = vshll.u32 %v189_v52, 30  ;;  %v213_v32 = vsub.s32 4, %v189_v52 }
  0x3e   :  { %v91_v53 = vclz %v251_v51  ;;  %vm122_vm2 = vcmp.eq.s32.totalorder %v117_v37, 2  ;;  %vm119_vm3 = vcmp.eq.s32.totalorder %v117_v37, 0  ;;  %vm118_vm4 = vcmp.lt.s32.totalorder %v117_v37, 2 }
  0x3f   :  { %v191_v56 = vsub.s32 %v187_v48, %v190_v54  ;;  %v214_v36 = vsel %vm129_vm0, %v213_v32, %v189_v52 }
  0x40   :  { %v252_v55 = vadd.s32 4294967294, %v91_v53  ;;  %v216_v40 = vsel %vm128_vm1, 0, %v214_v36 }
  0x41   :  { %v193_v58 = vsub.s32 0, %v191_v56  ;;  %v220_v44 = vadd.s32 3, %v216_v40 }
  0x42   :  { %vm253_vm12 = vcmp.lt.s32.totalorder %v252_v55, 0 }
  0x43   :  { %v94_v22 = vsel %vm253_vm12, 0, %v252_v55  ;;  %v255_v62 = vmin.u32 %v193_v58, %v191_v56  ;;  %v221_v34 = vand.u32 3, %v220_v44 }
  0x44   :  { %v95_v59 = vsub.s32 32, %v94_v22  ;;  %v96_v60 = vshll.u32 %v87_v47, %v94_v22  ;;  %v99_v61 = vsub.s32 4294967266, %v94_v22 }
  0x45   :  { %v195_v5 = vclz %v255_v62  ;;  %vm226_vm6 = vcmp.eq.s32.totalorder %v221_v34, 2  ;;  %vm223_vm7 = vcmp.eq.s32.totalorder %v221_v34, 0  ;;  %vm222_vm8 = vcmp.lt.s32.totalorder %v221_v34, 2 }
  0x46   :  { %v97_v63 = vshrl.u32 %v79_v57, %v95_v59  ;;  %v100_v3 = vadd.s32 127, %v99_v61 }
  0x47   :  { %v256_v10 = vadd.s32 4294967294, %v195_v5 }
  0x48   :  { %v98_v8 = vor.u32 %v97_v63, %v96_v60  ;;  %v101_v9 = vshll.u32 %v100_v3, 23 }
  0x49   :  { %vm257_vm13 = vcmp.lt.s32.totalorder %v256_v10, 0 }
  0x4a   :  { %v102_v11 = vor.u32 4788187, %v101_v9  ;;  %v105_v12 = vcvt.s32.f32 %v98_v8  ;;  %v198_v7 = vsel %vm257_vm13, 0, %v256_v10 }
  0x4b   :  { %v199_v15 = vsub.s32 32, %v198_v7  ;;  %v200_v16 = vshll.u32 %v191_v56, %v198_v7  ;;  %v203_v17 = vsub.s32 4294967266, %v198_v7 }
  0x4c   :  { %v103_v14 = vand.u32 2147483647, %v102_v11 }
  0x4d   :  { %v201_v19 = vshrl.u32 %v183_v13, %v199_v15  ;;  %v204_v23 = vadd.s32 127, %v203_v17 }
  0x4e   :  { %v106_v18 = vmul.f32 %v105_v12, %v103_v14 }
  0x4f   :  { %v202_v21 = vor.u32 %v201_v19, %v200_v16  ;;  %v205_v26 = vshll.u32 %v204_v23, 23 }
  0x50   :  { %v107_v24 = vxor.u32 2147483648, %v106_v18 }
  0x51   :  { %v206_v29 = vor.u32 4788187, %v205_v26  ;;  %v209_v30 = vcvt.s32.f32 %v202_v21 }
  0x52   :  { %v108_v20 = vsel %vm25_vm14, %v107_v24, %v106_v18 }
  0x53   :  { %v111_v27 = vsel %vm24_vm15, %v360_v0, %v108_v20  ;;  %v207_v31 = vand.u32 2147483647, %v206_v29 }
  0x54   :  { %274 = vcosq.f32 %v111_v27 }
  0x55   :  { %276 = vsinq.f32 %v111_v27  ;;  %v210_v35 = vmul.f32 %v209_v30, %v207_v31 }
  0x57   :  { %v211_v2 = vxor.u32 2147483648, %v210_v35 }
  0x59   :  { %v212_v38 = vsel %vm129_vm0, %v211_v2, %v210_v35 }
  0x5a   :  { %v215_v39 = vsel %vm128_vm1, %v362_v1, %v212_v38 }
  0x5b   :  { %278 = vcosq.f32 %v215_v39 }
  0x5c   :  { %280 = vsinq.f32 %v215_v39 }
  0x5e   :  { %v275_v41 = vpop.eup %274 }
  0x5f   :  { %v277_v42 = vpop.eup %276  ;;  %v123_v43 = vxor.u32 2147483648, %v275_v41 }
  0x60   :  { %v120_v45 = vxor.u32 2147483648, %v277_v42 }
  0x61   :  { %v124_v4 = vsel %vm122_vm2, %v123_v43, %v277_v42 }
  0x62   :  { %v121_v46 = vsel %vm119_vm3, %v275_v41, %v120_v45 }
  0x63   :  { %v125_v47 = vsel %vm118_vm4, %v121_v46, %v124_v4 }
  0x64   :  { %v126_v48 = vsel %vm115_vm5, nan, %v125_v47 }
  0x65   :  { %v231_v49 = vmul.f32 30.0, %v126_v48  ;;  %v279_v50 = vpop.eup %278 }
  0x66   :  { %v281_v51 = vpop.eup %280  ;;  %v227_v52 = vxor.u32 2147483648, %v279_v50 }
  0x67   :  { %233 = vst [vmem:[#allocation5] sm:$0xff] %v231_v49  ;;  %v224_v53 = vxor.u32 2147483648, %v281_v51 }
  0x68   :  { %v228_v54 = vsel %vm226_vm6, %v227_v52, %v281_v51 }
  0x69   :  { %v225_v55 = vsel %vm223_vm7, %v279_v50, %v224_v53 }
  0x6a   :  { %v229_v0 = vsel %vm222_vm8, %v225_v55, %v228_v54 }
  0x6b   :  { %v230_v56 = vsel %vm219_vm9, nan, %v229_v0 }
  0x6c   :  { %v232_v57 = vmul.f32 30.0, %v230_v56 }
  0x6e   :  { %234 = vst [vmem:[#allocation5 + $0x8] sm:$0xff] %v232_v57 }
  0x6f   :  { %315 = shalt.err (!%p312_p12)
}
  0x70   :  { %s316_s22 = scalar_lea.hbm %s443_s1, 256 }
  0x71   :  { %p317_p13 = scmp.ne.s32.totalorder %s443_s1, %s316_s22  ;;  %p320_p0 = scmp.lt.u32.totalorder %s316_s22, %s443_s1 }
  0x73   :  { %p322_p1 = pnand %p320_p0, %p317_p13 }
  0x75   :  { %325 = shalt.err (!%p322_p1)
}
  0x76   :  { %244 = dma.vmem_to_hbm [thread:$0]  %s242_s18, 256, %s443_s1, [#allocation4]  }
  0x77   :  { %328 = dma.done.wait [#allocation4], 256  }
  0x78   :  { %329 = vsyncadd [#allocation4], 4294967040 }
  0x79   :  { %248 = vsyncpa [#allocation3], 1 }
  0x7a   :  { %249 = vsyncpa [#allocation4], 1 }

</bundles_post_ra>
